<compile_context>
chip_gen: v7x
topology: tpu7x:2x2x1
jax: 0.10.0
libtpu: 0.0.40
codegen_flags: <defaults>
</compile_context>

<pallas_src>
import functools

import jax
import jax.numpy as jnp
from jax import lax
from jax.experimental import pallas as pl
from jax.experimental.pallas import tpu as pltpu


def _ipl_kernel(mask_ref, depth_ref, gt_ref, halo_ref, out_ref, *,
                epsilon, th, w, nt_per):
    s = pl.program_id(1)          # core-split index      (parallel)
    i = pl.program_id(2)          # row-tile within split (arbitrary / reduction)

    @pl.when(i == 0)
    def _init():
        # Per-(batch, split) accumulator rows live in the revisited output block.
        out_ref[...] = jnp.zeros_like(out_ref)

    # Cast after load: inputs may stream as bf16; all math / accumulation in f32.
    m = mask_ref[...].astype(jnp.float32)        # (th, w)
    d = depth_ref[...].astype(jnp.float32)       # (th, w)
    g = gt_ref[...].astype(jnp.float32)          # (th, w)

    tile_idx = s * nt_per + i
    halo = halo_ref[tile_idx].astype(jnp.float32)    # (2, w)
    h_top = halo[0:1, :]                              # depth row just above tile
    h_bot = halo[1:2, :]                              # depth row just below tile

    one = jnp.float32(1.0)
    py = g * m + (one - g) * (one - m)
    logp = -jnp.log(py + jnp.float32(epsilon))
    wq = logp * py * (one - py)           # logP * py * (1 - py)
    c_t = wq * (m - g)                    # coefficient of (d - mu)^2
    b_t = wq * g                          # constant term of the variance part

    # ---- 3x3 Sobel, separable, entirely in-register --------------------------
    # Row taps: sublane roll (XLU slot) + halo patch at first / last tile row.
    row = lax.broadcasted_iota(jnp.int32, (th, 1), 0)
    r_up = jnp.where(row == 0, h_top,
                     pltpu.roll(d, shift=1, axis=0))            # d[j-1]
    r_dn = jnp.where(row == th - 1, h_bot,
                     pltpu.roll(d, shift=th - 1, axis=0))       # d[j+1] (== -1 mod th)

    a = r_up + 2.0 * d + r_dn            # sobel_x row combine [1, 2, 1]^T
    bvert = r_dn - r_up                  # sobel_y row combine [-1, 0, 1]^T

    # Column taps: lane roll (XLU slot); zero the wrapped edge lane (image pad).
    col = lax.broadcasted_iota(jnp.int32, (1, w), 1)
    not_first = col != 0
    not_last = col != (w - 1)
    a_p = jnp.where(not_last, pltpu.roll(a, shift=w - 1, axis=1), 0.0)      # a[c+1]
    a_m = jnp.where(not_first, pltpu.roll(a, shift=1, axis=1), 0.0)         # a[c-1]
    b_p = jnp.where(not_last, pltpu.roll(bvert, shift=w - 1, axis=1), 0.0)
    b_m = jnp.where(not_first, pltpu.roll(bvert, shift=1, axis=1), 0.0)

    gx = a_p - a_m                       # column kernel [-1, 0, 1]
    gy = b_m + 2.0 * bvert + b_p         # column kernel [ 1, 2, 1]
    grad = (jnp.abs(gx) + jnp.abs(gy)) * logp

    # ---- streaming partial sums: reduce rows, keep lanes, one fused RMW ------
    def rsum(x):
        return jnp.sum(x, axis=0, keepdims=True)     # (1, w)

    cd = c_t * d
    zrow = jnp.zeros((1, w), jnp.float32)
    slab = jnp.concatenate(
        [rsum(d * g),        # S_dg
         rsum(g),            # S_g
         rsum(c_t),          # S_C
         rsum(cd),           # S_Cd
         rsum(cd * d),       # S_Cd2
         rsum(b_t + grad),   # S_B + S_grad (fused reductions)
         zrow, zrow], axis=0)                        # (8, w)
    out_ref[...] += slab


def _pick_row_tile(H, W, requested=None):
    """Largest (8,128)-legal row tile with <= ~2 MiB of f32 per input tile."""
    if requested is not None:
        assert H % requested == 0, "row_tile must divide H"
        assert requested == H or requested % 8 == 0, \
            "row_tile must equal H or be a multiple of 8"
        return requested
    max_elems = 512 * 1024                 # ~2 MiB f32 per input tile
    if H * W <= max_elems:
        return H                           # whole image fits comfortably
    cands = [t for t in range(8, H, 8) if H % t == 0]
    fits = [t for t in cands if t * W <= max_elems]
    if fits:
        return max(fits)
    if cands:
        return min(cands)                  # smallest legal tile; may exceed budget
    # TODO(synk): pad H to a multiple of 8 (and mask padded rows) when H has no
    # multiple-of-8 divisor instead of falling back to th == H.
    return H


def _pick_core_split(nt, requested=None):
    if requested is not None:
        assert nt % requested == 0, "core_split must divide the number of row tiles"
        return requested
    return 2 if (nt >= 2 and nt % 2 == 0) else 1


def integrity_prior_loss(mask, depth_map, gt, epsilon=1e-8, row_tile=None,
                         core_split=None):
    """Pallas implementation. Inputs are NCHW with C == 1. Returns scalar loss."""
    B, C, H, W = mask.shape
    assert C == 1, "Sobel conv in the reference module is Conv2d(1, 1, 3)"
    # Keep native dtype (bf16 halves HBM traffic); cast to f32 inside the kernel.
    m = mask.reshape(B, H, W)
    d = depth_map.reshape(B, H, W)
    g = gt.reshape(B, H, W)

    th = _pick_row_tile(H, W, row_tile)
    nt = H // th
    ncs = _pick_core_split(nt, core_split)
    nt_per = nt // ncs

    # Per-tile halo rows (depth row just above / below each tile; zero at the
    # image border).  The whole (nt, 2, W) slab is DMA'd once per batch element.
    zrow = jnp.zeros((B, 1, W), d.dtype)
    top = jnp.concatenate([zrow, d[:, th - 1:H - 1:th, :]], axis=1)   # (B, nt, W)
    bot = jnp.concatenate([d[:, th:H:th, :], zrow], axis=1)           # (B, nt, W)
    halos = jnp.stack([top, bot], axis=2)                             # (B, nt, 2, W)

    kernel = functools.partial(_ipl_kernel, epsilon=float(epsilon), th=th, w=W,
                               nt_per=nt_per)
    tile_map = lambda b, s, i: (b, s * nt_per + i, 0)

    partials = pl.pallas_call(
        kernel,
        out_shape=jax.ShapeDtypeStruct((B, ncs, 8, W), jnp.float32),
        grid_spec=pltpu.PrefetchScalarGridSpec(
            num_scalar_prefetch=0,
            grid=(B, ncs, nt_per),
            in_specs=[
                pl.BlockSpec((None, th, W), tile_map),                        # mask
                pl.BlockSpec((None, th, W), tile_map),                        # depth
                pl.BlockSpec((None, th, W), tile_map),                        # gt
                pl.BlockSpec((None, nt, 2, W), lambda b, s, i: (b, 0, 0, 0)),  # halos
            ],
            out_specs=pl.BlockSpec((None, None, 8, W),
                                   lambda b, s, i: (b, s, 0, 0)),
        ),
        compiler_params=pltpu.CompilerParams(
            dimension_semantics=("parallel", "parallel", "arbitrary"),
            vmem_limit_bytes=32 * 1024 * 1024),
    )(m, d, g, halos)

    # Tiny final combine (8 * W * B * ncs values) in plain JAX.
    p = jnp.sum(partials, axis=(0, 1, 3))       # (8,) global accumulators
    mu = p[0] / p[1]                            # sum(d*gt) / sum(gt)
    n = jnp.float32(B * H * W)
    # mean(variance) + mean(grad) with (d - mu)^2 expanded:
    #   sum(C*d^2) - 2*mu*sum(C*d) + mu^2*sum(C) + sum(B) + sum(grad)
    # NOTE: the expanded form can lose precision when depth >> its spread; it is
    # exact enough for normalized depth in [0, 1] as used by the reference module.
    return (p[4] - 2.0 * mu * p[3] + mu * mu * p[2] + p[5]) / n


def _reference_loss(mask, depth_map, gt, epsilon=1e-8):
    """Pure-JAX reference mirroring the PyTorch forward (for verification)."""
    py = gt * mask + (1 - gt) * (1 - mask)
    FP = (1 - py) * mask
    FN = (1 - py) * gt
    logP = -jnp.log(py + epsilon)
    diff = (depth_map - (depth_map * gt).sum() / gt.sum()) ** 2
    vareight = (diff * FP + (1 - diff) * FN) * py
    variance_loss = jnp.mean(logP * vareight)

    kx = jnp.array([[[[-1, 0, 1], [-2, 0, 2], [-1, 0, 1]]]], jnp.float32)
    ky = jnp.array([[[[-1, -2, -1], [0, 0, 0], [1, 2, 1]]]], jnp.float32)
    conv = lambda x, k: lax.conv_general_dilated(
        x, k, window_strides=(1, 1), padding=((1, 1), (1, 1)),
        dimension_numbers=("NCHW", "OIHW", "NCHW"))
    grad = (jnp.abs(conv(depth_map, kx)) + jnp.abs(conv(depth_map, ky))) * logP
    return variance_loss + jnp.mean(grad)


if __name__ == "__main__":
    k1, k2, k3, k4, k5, k6 = jax.random.split(jax.random.PRNGKey(0), 6)

    # Test 1: small shape, auto tiling (single tile per batch, single split).
    B, C, H, W = 2, 1, 16, 16
    mask = jax.random.uniform(k1, (B, C, H, W), dtype=jnp.float32)
    depth = jax.random.uniform(k2, (B, C, H, W), dtype=jnp.float32)
    gt = jax.random.uniform(k3, (B, C, H, W), dtype=jnp.float32)
    ref = _reference_loss(mask, depth, gt)
    loss_auto = jax.block_until_ready(integrity_prior_loss(mask, depth, gt))
    assert jnp.allclose(loss_auto, ref, rtol=1e-4, atol=1e-5), (loss_auto, ref)

    # Test 2: multi-tile + halo + dual-core-split path
    # (H=32, W=128 lane-dense, row_tile=8 -> nt=4, core_split=2, 2 tiles/core).
    B2, H2, W2 = 2, 32, 128
    mask2 = jax.random.uniform(k4, (B2, 1, H2, W2), dtype=jnp.float32)
    depth2 = jax.random.uniform(k5, (B2, 1, H2, W2), dtype=jnp.float32)
    gt2 = jax.random.uniform(k6, (B2, 1, H2, W2), dtype=jnp.float32)
    ref2 = _reference_loss(mask2, depth2, gt2)
    loss_tiled = jax.block_until_ready(
        integrity_prior_loss(mask2, depth2, gt2, row_tile=8, core_split=2))
    assert jnp.allclose(loss_tiled, ref2, rtol=1e-4, atol=1e-5), (loss_tiled, ref2)

    print("KERNEL_OK")
</pallas_src>

<mosaic_0001>
module attributes {stable_mosaic.version = 11 : i64} {
  func.func @_ipl_kernel(%arg0: i32, %arg1: i32, %arg2: i32, %arg3: memref<1x16x16xf32, #tpu.memory_space<vmem>>, %arg4: memref<1x16x16xf32, #tpu.memory_space<vmem>>, %arg5: memref<1x16x16xf32, #tpu.memory_space<vmem>>, %arg6: memref<1x1x2x16xf32, #tpu.memory_space<vmem>>, %arg7: memref<1x1x8x16xf32, #tpu.memory_space<vmem>>) attributes {dimension_semantics = [#tpu.dimension_semantics<parallel>, #tpu.dimension_semantics<parallel>, #tpu.dimension_semantics<arbitrary>], iteration_bounds = array<i64: 2, 1, 1>, scalar_prefetch = 0 : i64, scratch_operands = 0 : i64, tpu.core_type = #tpu.core_type<tc>, window_params = [{transform_indices = @transform_0, window_bounds = array<i64: 1, 16, 16>}, {transform_indices = @transform_1, window_bounds = array<i64: 1, 16, 16>}, {transform_indices = @transform_2, window_bounds = array<i64: 1, 16, 16>}, {transform_indices = @transform_3, window_bounds = array<i64: 1, 1, 2, 16>}, {transform_indices = @transform_4, window_bounds = array<i64: 1, 1, 8, 16>}]} {
    %c0_i32 = arith.constant 0 : i32
    %0 = arith.cmpi eq, %arg2, %c0_i32 : i32
    %1 = arith.extui %0 : i1 to i32
    %c0_i32_0 = arith.constant 0 : i32
    %2 = arith.cmpi ne, %1, %c0_i32_0 : i32
    scf.if %2 {
      %cst_46 = arith.constant 0.000000e+00 : f32
      %115 = vector.broadcast %cst_46 : f32 to vector<8x16xf32>
      %c0_47 = arith.constant 0 : index
      %c0_48 = arith.constant 0 : index
      %c0_49 = arith.constant 0 : index
      %c0_50 = arith.constant 0 : index
      %116 = vector.load %arg7[%c0_47, %c0_48, %c0_49, %c0_50] : memref<1x1x8x16xf32, #tpu.memory_space<vmem>>, vector<1x1x8x16xf32>
      %117 = vector.shape_cast %116 : vector<1x1x8x16xf32> to vector<8x16xf32>
      %118 = vector.shape_cast %115 : vector<8x16xf32> to vector<1x1x8x16xf32>
      tpu.vector_store %arg7[%c0_47, %c0_48, %c0_49, %c0_50], %118 {strides = array<i32>} : memref<1x1x8x16xf32, #tpu.memory_space<vmem>>, vector<1x1x8x16xf32>,
    } else {
    }
    %c0 = arith.constant 0 : index
    %c0_1 = arith.constant 0 : index
    %c0_2 = arith.constant 0 : index
    %3 = vector.load %arg3[%c0, %c0_1, %c0_2] : memref<1x16x16xf32, #tpu.memory_space<vmem>>, vector<1x16x16xf32>
    %4 = vector.shape_cast %3 : vector<1x16x16xf32> to vector<16x16xf32>
    %c0_3 = arith.constant 0 : index
    %c0_4 = arith.constant 0 : index
    %c0_5 = arith.constant 0 : index
    %5 = vector.load %arg4[%c0_3, %c0_4, %c0_5] : memref<1x16x16xf32, #tpu.memory_space<vmem>>, vector<1x16x16xf32>
    %6 = vector.shape_cast %5 : vector<1x16x16xf32> to vector<16x16xf32>
    %c0_6 = arith.constant 0 : index
    %c0_7 = arith.constant 0 : index
    %c0_8 = arith.constant 0 : index
    %7 = vector.load %arg5[%c0_6, %c0_7, %c0_8] : memref<1x16x16xf32, #tpu.memory_space<vmem>>, vector<1x16x16xf32>
    %8 = vector.shape_cast %7 : vector<1x16x16xf32> to vector<16x16xf32>
    %c1_i32 = arith.constant 1 : i32
    %9 = arith.muli %arg1, %c1_i32 : i32
    %10 = arith.addi %9, %arg2 : i32
    %c0_9 = arith.constant 0 : index
    %11 = arith.index_cast %10 : i32 to index
    %c0_10 = arith.constant 0 : index
    %c0_11 = arith.constant 0 : index
    %12 = vector.load %arg6[%c0_9, %11, %c0_10, %c0_11] : memref<1x1x2x16xf32, #tpu.memory_space<vmem>>, vector<1x1x2x16xf32>
    %13 = vector.shape_cast %12 : vector<1x1x2x16xf32> to vector<2x16xf32>
    %14 = vector.extract_strided_slice %13 {offsets = [0, 0], sizes = [1, 16], strides = [1, 1]} : vector<2x16xf32> to vector<1x16xf32>
    %15 = vector.extract_strided_slice %13 {offsets = [1, 0], sizes = [1, 16], strides = [1, 1]} : vector<2x16xf32> to vector<1x16xf32>
    %16 = arith.mulf %8, %4 : vector<16x16xf32>
    %cst = arith.constant 1.000000e+00 : f32
    %17 = vector.broadcast %cst : f32 to vector<16x16xf32>
    %18 = arith.subf %17, %8 : vector<16x16xf32>
    %cst_12 = arith.constant 1.000000e+00 : f32
    %19 = vector.broadcast %cst_12 : f32 to vector<16x16xf32>
    %20 = arith.subf %19, %4 : vector<16x16xf32>
    %21 = arith.mulf %18, %20 : vector<16x16xf32>
    %22 = arith.addf %16, %21 : vector<16x16xf32>
    %cst_13 = arith.constant 9.99999993E-9 : f32
    %23 = vector.broadcast %cst_13 : f32 to vector<16x16xf32>
    %24 = arith.addf %22, %23 : vector<16x16xf32>
    %25 = math.log %24 : vector<16x16xf32>
    %cst_14 = arith.constant 0.000000e+00 : f32
    %26 = vector.broadcast %cst_14 : f32 to vector<16x16xf32>
    %27 = arith.subf %26, %25 : vector<16x16xf32>
    %28 = arith.mulf %27, %22 : vector<16x16xf32>
    %cst_15 = arith.constant 1.000000e+00 : f32
    %29 = vector.broadcast %cst_15 : f32 to vector<16x16xf32>
    %30 = arith.subf %29, %22 : vector<16x16xf32>
    %31 = arith.mulf %28, %30 : vector<16x16xf32>
    %32 = arith.subf %4, %8 : vector<16x16xf32>
    %33 = arith.mulf %31, %32 : vector<16x16xf32>
    %34 = arith.mulf %31, %8 : vector<16x16xf32>
    %35 = tpu.iota {dimensions = array<i32: 0>} : vector<16x1xi32>
    %c0_i32_16 = arith.constant 0 : i32
    %36 = vector.broadcast %c0_i32_16 : i32 to vector<16x1xi32>
    %37 = arith.cmpi eq, %35, %36 : vector<16x1xi32>
    %c1_i32_17 = arith.constant 1 : i32
    %38 = tpu.dynamic_rotate %6 by %c1_i32_17 dim 0 : vector<16x16xf32>, i32 -> vector<16x16xf32>
    %39 = vector.shape_cast %37 : vector<16x1xi1> to vector<16x1xi1>
    %40 = vector.broadcast %39 : vector<16x1xi1> to vector<16x16xi1>
    %41 = vector.shape_cast %14 : vector<1x16xf32> to vector<1x16xf32>
    %42 = vector.broadcast %41 : vector<1x16xf32> to vector<16x16xf32>
    %43 = arith.select %40, %42, %38 : vector<16x16xi1>, vector<16x16xf32>
    %c15_i32 = arith.constant 15 : i32
    %44 = vector.broadcast %c15_i32 : i32 to vector<16x1xi32>
    %45 = arith.cmpi eq, %35, %44 : vector<16x1xi32>
    %c15_i32_18 = arith.constant 15 : i32
    %46 = tpu.dynamic_rotate %6 by %c15_i32_18 dim 0 : vector<16x16xf32>, i32 -> vector<16x16xf32>
    %47 = vector.shape_cast %45 : vector<16x1xi1> to vector<16x1xi1>
    %48 = vector.broadcast %47 : vector<16x1xi1> to vector<16x16xi1>
    %49 = vector.shape_cast %15 : vector<1x16xf32> to vector<1x16xf32>
    %50 = vector.broadcast %49 : vector<1x16xf32> to vector<16x16xf32>
    %51 = arith.select %48, %50, %46 : vector<16x16xi1>, vector<16x16xf32>
    %cst_19 = arith.constant 2.000000e+00 : f32
    %52 = vector.broadcast %cst_19 : f32 to vector<16x16xf32>
    %53 = arith.mulf %52, %6 : vector<16x16xf32>
    %54 = arith.addf %43, %53 : vector<16x16xf32>
    %55 = arith.addf %54, %51 : vector<16x16xf32>
    %56 = arith.subf %51, %43 : vector<16x16xf32>
    %57 = tpu.iota {dimensions = array<i32: 1>} : vector<1x16xi32>
    %c0_i32_20 = arith.constant 0 : i32
    %58 = vector.broadcast %c0_i32_20 : i32 to vector<1x16xi32>
    %59 = arith.cmpi ne, %57, %58 : vector<1x16xi32>
    %c15_i32_21 = arith.constant 15 : i32
    %60 = vector.broadcast %c15_i32_21 : i32 to vector<1x16xi32>
    %61 = arith.cmpi ne, %57, %60 : vector<1x16xi32>
    %c15_i32_22 = arith.constant 15 : i32
    %62 = tpu.dynamic_rotate %55 by %c15_i32_22 dim 1 : vector<16x16xf32>, i32 -> vector<16x16xf32>
    %cst_23 = arith.constant 0.000000e+00 : f32
    %63 = vector.shape_cast %61 : vector<1x16xi1> to vector<1x16xi1>
    %64 = vector.broadcast %63 : vector<1x16xi1> to vector<16x16xi1>
    %65 = vector.broadcast %cst_23 : f32 to vector<16x16xf32>
    %66 = arith.select %64, %62, %65 : vector<16x16xi1>, vector<16x16xf32>
    %c1_i32_24 = arith.constant 1 : i32
    %67 = tpu.dynamic_rotate %55 by %c1_i32_24 dim 1 : vector<16x16xf32>, i32 -> vector<16x16xf32>
    %cst_25 = arith.constant 0.000000e+00 : f32
    %68 = vector.shape_cast %59 : vector<1x16xi1> to vector<1x16xi1>
    %69 = vector.broadcast %68 : vector<1x16xi1> to vector<16x16xi1>
    %70 = vector.broadcast %cst_25 : f32 to vector<16x16xf32>
    %71 = arith.select %69, %67, %70 : vector<16x16xi1>, vector<16x16xf32>
    %c15_i32_26 = arith.constant 15 : i32
    %72 = tpu.dynamic_rotate %56 by %c15_i32_26 dim 1 : vector<16x16xf32>, i32 -> vector<16x16xf32>
    %cst_27 = arith.constant 0.000000e+00 : f32
    %73 = vector.shape_cast %61 : vector<1x16xi1> to vector<1x16xi1>
    %74 = vector.broadcast %73 : vector<1x16xi1> to vector<16x16xi1>
    %75 = vector.broadcast %cst_27 : f32 to vector<16x16xf32>
    %76 = arith.select %74, %72, %75 : vector<16x16xi1>, vector<16x16xf32>
    %c1_i32_28 = arith.constant 1 : i32
    %77 = tpu.dynamic_rotate %56 by %c1_i32_28 dim 1 : vector<16x16xf32>, i32 -> vector<16x16xf32>
    %cst_29 = arith.constant 0.000000e+00 : f32
    %78 = vector.shape_cast %59 : vector<1x16xi1> to vector<1x16xi1>
    %79 = vector.broadcast %78 : vector<1x16xi1> to vector<16x16xi1>
    %80 = vector.broadcast %cst_29 : f32 to vector<16x16xf32>
    %81 = arith.select %79, %77, %80 : vector<16x16xi1>, vector<16x16xf32>
    %82 = arith.subf %66, %71 : vector<16x16xf32>
    %cst_30 = arith.constant 2.000000e+00 : f32
    %83 = vector.broadcast %cst_30 : f32 to vector<16x16xf32>
    %84 = arith.mulf %83, %56 : vector<16x16xf32>
    %85 = arith.addf %81, %84 : vector<16x16xf32>
    %86 = arith.addf %85, %76 : vector<16x16xf32>
    %87 = math.absf %82 : vector<16x16xf32>
    %88 = math.absf %86 : vector<16x16xf32>
    %89 = arith.addf %87, %88 : vector<16x16xf32>
    %90 = arith.mulf %89, %27 : vector<16x16xf32>
    %91 = arith.mulf %33, %6 : vector<16x16xf32>
    %cst_31 = arith.constant 0.000000e+00 : f32
    %92 = vector.broadcast %cst_31 : f32 to vector<1x16xf32>
    %93 = arith.mulf %6, %8 : vector<16x16xf32>
    %cst_32 = arith.constant dense<0.000000e+00> : vector<16xf32>
    %94 = vector.multi_reduction <add>, %93, %cst_32 [0] : vector<16x16xf32> to vector<16xf32>
    %95 = vector.shape_cast %94 : vector<16xf32> to vector<1x16xf32>
    %cst_33 = arith.constant dense<0.000000e+00> : vector<16xf32>
    %96 = vector.multi_reduction <add>, %8, %cst_33 [0] : vector<16x16xf32> to vector<16xf32>
    %97 = vector.shape_cast %96 : vector<16xf32> to vector<1x16xf32>
    %cst_34 = arith.constant dense<0.000000e+00> : vector<16xf32>
    %98 = vector.multi_reduction <add>, %33, %cst_34 [0] : vector<16x16xf32> to vector<16xf32>
    %99 = vector.shape_cast %98 : vector<16xf32> to vector<1x16xf32>
    %cst_35 = arith.constant dense<0.000000e+00> : vector<16xf32>
    %100 = vector.multi_reduction <add>, %91, %cst_35 [0] : vector<16x16xf32> to vector<16xf32>
    %101 = vector.shape_cast %100 : vector<16xf32> to vector<1x16xf32>
    %102 = arith.mulf %91, %6 : vector<16x16xf32>
    %cst_36 = arith.constant dense<0.000000e+00> : vector<16xf32>
    %103 = vector.multi_reduction <add>, %102, %cst_36 [0] : vector<16x16xf32> to vector<16xf32>
    %104 = vector.shape_cast %103 : vector<16xf32> to vector<1x16xf32>
    %105 = arith.addf %34, %90 : vector<16x16xf32>
    %cst_37 = arith.constant dense<0.000000e+00> : vector<16xf32>
    %106 = vector.multi_reduction <add>, %105, %cst_37 [0] : vector<16x16xf32> to vector<16xf32>
    %107 = vector.shape_cast %106 : vector<16xf32> to vector<1x16xf32>
    %108 = tpu.concatenate %95, %97, %99, %101, %104, %107, %92, %92 in 0 : vector<1x16xf32>, vector<1x16xf32>, vector<1x16xf32>, vector<1x16xf32>, vector<1x16xf32>, vector<1x16xf32>, vector<1x16xf32>, vector<1x16xf32> -> vector<8x16xf32>
    %c0_38 = arith.constant 0 : index
    %c0_39 = arith.constant 0 : index
    %c0_40 = arith.constant 0 : index
    %c0_41 = arith.constant 0 : index
    %109 = vector.load %arg7[%c0_38, %c0_39, %c0_40, %c0_41] : memref<1x1x8x16xf32, #tpu.memory_space<vmem>>, vector<1x1x8x16xf32>
    %110 = vector.shape_cast %109 : vector<1x1x8x16xf32> to vector<8x16xf32>
    %111 = arith.addf %110, %108 : vector<8x16xf32>
    %c0_42 = arith.constant 0 : index
    %c0_43 = arith.constant 0 : index
    %c0_44 = arith.constant 0 : index
    %c0_45 = arith.constant 0 : index
    %112 = vector.load %arg7[%c0_42, %c0_43, %c0_44, %c0_45] : memref<1x1x8x16xf32, #tpu.memory_space<vmem>>, vector<1x1x8x16xf32>
    %113 = vector.shape_cast %112 : vector<1x1x8x16xf32> to vector<8x16xf32>
    %114 = vector.shape_cast %111 : vector<8x16xf32> to vector<1x1x8x16xf32>
    tpu.vector_store %arg7[%c0_42, %c0_43, %c0_44, %c0_45], %114 {strides = array<i32>} : memref<1x1x8x16xf32, #tpu.memory_space<vmem>>, vector<1x1x8x16xf32>,
    return
  }
  func.func @transform_0(%arg0: i32, %arg1: i32, %arg2: i32) -> (i32, i32, i32) {
    %c1_i32 = arith.constant 1 : i32
    %0 = arith.muli %arg1, %c1_i32 : i32
    %1 = arith.addi %0, %arg2 : i32
    %c0_i32 = arith.constant 0 : i32
    %c0_i32_0 = arith.constant 0 : i32
    return %arg0, %1, %c0_i32 : i32, i32, i32
  }
  func.func @transform_1(%arg0: i32, %arg1: i32, %arg2: i32) -> (i32, i32, i32) {
    %c1_i32 = arith.constant 1 : i32
    %0 = arith.muli %arg1, %c1_i32 : i32
    %1 = arith.addi %0, %arg2 : i32
    %c0_i32 = arith.constant 0 : i32
    %c0_i32_0 = arith.constant 0 : i32
    return %arg0, %1, %c0_i32 : i32, i32, i32
  }
  func.func @transform_2(%arg0: i32, %arg1: i32, %arg2: i32) -> (i32, i32, i32) {
    %c1_i32 = arith.constant 1 : i32
    %0 = arith.muli %arg1, %c1_i32 : i32
    %1 = arith.addi %0, %arg2 : i32
    %c0_i32 = arith.constant 0 : i32
    %c0_i32_0 = arith.constant 0 : i32
    return %arg0, %1, %c0_i32 : i32, i32, i32
  }
  func.func @transform_3(%arg0: i32, %arg1: i32, %arg2: i32) -> (i32, i32, i32, i32) {
    %c0_i32 = arith.constant 0 : i32
    %c0_i32_0 = arith.constant 0 : i32
    %c0_i32_1 = arith.constant 0 : i32
    %c0_i32_2 = arith.constant 0 : i32
    return %arg0, %c0_i32, %c0_i32_0, %c0_i32_1 : i32, i32, i32, i32
  }
  func.func @transform_4(%arg0: i32, %arg1: i32, %arg2: i32) -> (i32, i32, i32, i32) {
    %c0_i32 = arith.constant 0 : i32
    %c0_i32_0 = arith.constant 0 : i32
    %c0_i32_1 = arith.constant 0 : i32
    return %arg0, %arg1, %c0_i32, %c0_i32_0 : i32, i32, i32, i32
  }
}

</mosaic_0001>

<bundles_post_ra>
// kernel: tpu_custom_call.1
= control target key start
LH: loop header
LB: loop body
LE: loop exit
PB: predicated region body
PF: predicated region fallthrough
CT: control target
= control target key end

     0   :  { %s1501_s0 = inlined_call_operand.hbm [shape: f32[2,16,16], index: 0, kind: input, shape index: {}]   ;;  %s1502_s1 = inlined_call_operand.hbm [shape: f32[2,16,16], index: 1, kind: input, shape index: {}]   ;;  %s1503_s2 = inlined_call_operand.hbm [shape: f32[2,16,16], index: 2, kind: input, shape index: {}]   ;;  %s1504_s3 = inlined_call_operand.vmem [shape: f32[2,1,2,16], index: 3, kind: input, shape index: {}]   ;;  %s1505_s4 = inlined_call_operand.hbm [shape: f32[2,1,8,16], index: 4, kind: output, shape index: {}]  }
   0x1   :  { %1517 = sst [smem:[#allocation16_spill]] %s1502_s1 }
   0x2   :  { %9 = vsyncpa [#allocation3], 0 }
   0x3   :  { %11 = vsyncpa [#allocation3 + $0x1], 0 }
   0x4   :  { %12 = vsyncpa [#allocation6], 0 }
   0x5   :  { %14 = vsyncpa [#allocation6 + $0x1], 0 }
   0x6   :  { %15 = vsyncpa [#allocation4], 0 }
   0x7   :  { %17 = vsyncpa [#allocation4 + $0x1], 0  ;;  %s1102_s15 = smov 0   ;;  %s1104_s16 = smov 0  }
   0x8   :  { %s1106_s17 = smov 0   ;;  %s1108_s18 = smov 0  }
   0x9   :  { %s1110_s19 = smov 0   ;;  %s1112_s20 = smov 0  }
   0xa LB: > { %1518 = sst [smem:[#allocation12_spill]] %s1061_s19  ;;  %s1133_s21 = sadd.s32 4294967295, %s1065_s20   ;;  %s1065_s20 = sphi %s1112_s20, %s23_s20   ;;  %s1061_s19 = sphi %s1110_s19, %s1543_s19   ;;  %s1057_s18 = sphi %s1108_s18, %s1542_s18   ;;  %s1053_s17 = sphi %s1106_s17, %s1546_s17   ;;  %s1049_s16 = sphi %s1104_s16, %s1545_s16   ;;  %s1045_s15 = sphi %s1102_s15, %s1544_s15  }
   0xb   : > { %1519 = sst [smem:[#allocation13_spill]] %s1065_s20  ;;  %s782_s22 = sadd.s32 4294967294, %s1065_s20  }
   0xc   : > { %s42_s23 = sadd.s32 1, %s1061_s19  ;;  %s53_s24 = sadd.s32 1, %s1053_s17 }
   0xd   : > { %p44_p0 = scmp.ge.s32.totalorder %s42_s23, 2  ;;  %p60_p1 = scmp.ne.s32.totalorder %s1053_s17, %s1049_s16 }
   0xe   : > { %p61_p2 = scmp.eq.s32.totalorder %s1065_s20, 0  ;;  %p66_p3 = scmp.ne.s32.totalorder %s1049_s16, %s1045_s15 }
   0xf   : > { %s1548_s23 = smov (%p44_p0, %s42_s23), 0  ;;  %p67_p5 = scmp.eq.s32.totalorder %s1133_s21, 0 }
  0x10   : > { %1520 = sst [smem:[#allocation14_spill]] %s1548_s23  ;;  %p1145_p4 = por %p61_p2, %p60_p1 }
  0x11   : > { %s48_s26 = ssub.s32 %s1061_s19, %s1548_s23  ;;  %p178_p6 = scmp.eq.s32.totalorder %s1133_s21, 1 }
  0x12   : > { %p51_p7 = scmp.eq.s32.totalorder %s48_s26, 0  ;;  %p1153_p8 = por %p67_p5, %p66_p3 }
  0x13   : > { %p1157_p9 = por %p178_p6, %p60_p1  ;;  %p184_p10 = scmp.eq.s32.totalorder %s782_s22, 1 }
  0x14   : > { %s1522_s27 = scalar_select %p1153_p8, 1, 0 }
  0x15   : > { %s1523_s28 = scalar_select %p1157_p9, 1, 0 }
  0x16   : > { %s1162_s29 = scalar_select %p51_p7, %s1053_s17, %s53_s24  }
  0x17   : > { %p1164_p11 = por %p184_p10, %p66_p3  ;;  %p829_p13 = scmp.lt.s32.totalorder %s1065_s20, 2 }
  0x18   : > { %1524 = sst [smem:[#allocation15_spill]] %s1162_s29  ;;  %s1506_s5 = sand.u32 1, %s1053_s17  }
  0x19   : > { %s1525_s30 = scalar_select %p1164_p11, 1, 0 }
  0x1a   : > { %s1173_s6 = sshll.u32 %s1506_s5, 4  ;;  %s1176_s7 = sshll.u32 %s1061_s19, 8 }
  0x1b   : > { %p1180_p0 = pnand %p829_p13, %p1145_p4  ;;  %s228_s9 = sand.u32 1, %s1065_s20  }
  0x1c   : > { %s1527_s1 = sld [smem:[#allocation16_spill]]  ;;  %s232_s13 = scalar_lea.vmem [#allocation5], %s1173_s6 }
  0x1d   : > { %s242_s14 = sshll.u32 %s232_s13, 4  ;;  %s1196_s22 = scalar_lea.sflag [#allocation6], %s228_s9  ;;  %s1193_s14 = int_to_ptr.vmem [resolvable:$true] %s242_s14 }
  0x1e   : > { %p1202_p4 = pneg %p1180_p0 }
  0x22   : > { %s1189_s12 = scalar_lea.hbm %s1527_s1, %s1176_s7  ;;  %s894_s11 = scalar_lea.hbm %s1527_s1, 512 }
  0x23   : > { %s889_s24 = scalar_lea.hbm %s1189_s12, 256  ;;  %p895_p7 = scmp.lt.u32.totalorder %s1189_s12, %s1527_s1 }
  0x24   : > { %p890_p3 = scmp.ne.s32.totalorder %s1189_s12, %s889_s24  ;;  %p896_p10 = scmp.lt.u32.totalorder %s894_s11, %s889_s24 }
  0x25   : > { %p898_p12 = scmp.lt.u32.totalorder %s889_s24, %s1189_s12 }
  0x26   : > { %p892_p5 = pnand %p1202_p4, %p890_p3  ;;  %p897_p13 = por %p896_p10, %p895_p7 }
  0x28   : > { %p893_p6 = pneg %p892_p5  ;;  %p899_p1 = por %p898_p12, %p897_p13 }
  0x2a   : > { %p900_p2 = pnand %p899_p1, %p893_p6 }
  0x2c   : > { %903 = shalt.err (!%p900_p2)
}
  0x2d   : > { %s904_s9 = scalar_lea.vmem %s1193_s14, 256  ;;  %s1067_s26 = smov [#allocation5]  }
  0x2e   : > { %p905_p3 = scmp.ne.s32.totalorder %s1193_s14, %s904_s9  ;;  %s909_s10 = sshll.u32 %s1067_s26, 4  ;;  %s910_s10 = int_to_ptr.vmem [resolvable:$false] %s909_s10 }
  0x2f   : > { %s911_s5 = scalar_lea.vmem %s910_s10, 512  ;;  %p912_p9 = scmp.lt.s32.totalorder %s1193_s14, %s910_s10 }
  0x30   : > { %p907_p5 = pnand %p905_p3, %p1202_p4  ;;  %p913_p8 = scmp.lt.s32.totalorder %s911_s5, %s904_s9 }
  0x32   : > { %p908_p11 = pneg %p907_p5  ;;  %p914_p7 = por %p913_p8, %p912_p9 }
  0x34   : > { %p915_p10 = pnand %p914_p7, %p908_p11 }
  0x36   : > { %918 = shalt.err (!%p915_p10)
}
  0x37   : > { %s1509_s24 = smov 128   ;;  %s1511_s11 = smov 8  }
  0x38   : > { %821 = dma.hbm_to_vmem [thread:$0]  (!%p1180_p0), %s1189_s12, 256, %s1193_s14, %s1196_s22, %s1509_s24, %s1509_s24, %s1511_s11  }
  0x39   : > { %p1529_p8 = scmp.lt.s32.totalorder %s1065_s20, 3  ;;  %p1530_p9 = scmp.ge.s32.totalorder %s1065_s20, 1 }
  0x3a   : > { %s1241_s10 = scalar_lea.hbm %s1501_s0, %s1176_s7  ;;  %s208_s5 = scalar_lea.vmem [#allocation2], %s1173_s6 }
  0x3b   : > { %p1233_p11 = pnand %p1530_p9, %p1529_p8  ;;  %s218_s1 = sshll.u32 %s208_s5, 4  ;;  %s1244_s1 = int_to_ptr.vmem [resolvable:$true] %s218_s1 }
  0x3c   : > { %s1250_s24 = scalar_lea.hbm %s1503_s2, %s1176_s7  ;;  %s1532_s11 = sand.u32 1, %s1053_s17  }
  0x3d   : > { %s1531_s13 = scalar_select %p1233_p11, 1, 0 }
  0x3e   : > { %s1254_s23 = scalar_lea.sflag [#allocation3], %s1532_s11  ;;  %s919_s19 = scalar_lea.hbm %s1241_s10, 256 }
  0x3f   : > { %p920_p12 = scmp.ne.s32.totalorder %s1241_s10, %s919_s19  ;;  %s924_s29 = scalar_lea.hbm %s1501_s0, 512 }
  0x40   : > { %p925_p6 = scmp.lt.u32.totalorder %s1241_s10, %s1501_s0  ;;  %p926_p13 = scmp.lt.u32.totalorder %s924_s29, %s919_s19 }
  0x41   : > { %p922_p1 = pnand %p920_p12, %p1202_p4  ;;  %p928_p5 = scmp.lt.u32.totalorder %s919_s19, %s1241_s10 }
  0x42   : > { %p927_p3 = por %p926_p13, %p925_p6 }
  0x43   : > { %p923_p2 = pneg %p922_p1 }
  0x44   : > { %p929_p7 = por %p928_p5, %p927_p3 }
  0x46   : > { %p930_p10 = pnand %p929_p7, %p923_p2 }
  0x48   : > { %933 = shalt.err (!%p930_p10)
}
  0x49   : > { %s934_s7 = scalar_lea.vmem %s1244_s1, 256  ;;  %s1070_s11 = smov [#allocation2]  }
  0x4a   : > { %p935_p8 = scmp.ne.s32.totalorder %s1244_s1, %s934_s7  ;;  %s939_s12 = sshll.u32 %s1070_s11, 4  ;;  %s940_s12 = int_to_ptr.vmem [resolvable:$false] %s939_s12 }
  0x4b   : > { %s941_s20 = scalar_lea.vmem %s940_s12, 512  ;;  %p942_p1 = scmp.lt.s32.totalorder %s1244_s1, %s940_s12 }
  0x4c   : > { %p937_p9 = pnand %p935_p8, %p1202_p4  ;;  %p943_p11 = scmp.lt.s32.totalorder %s941_s20, %s934_s7 }
  0x4e   : > { %p938_p12 = pneg %p937_p9  ;;  %p944_p6 = por %p943_p11, %p942_p1 }
  0x50   : > { %p945_p13 = pnand %p944_p6, %p938_p12 }
  0x52   : > { %948 = shalt.err (!%p945_p13)
}
  0x53   : > { %s1533_s19 = smov 8   ;;  %s1534_s29 = smov 128  }
  0x54   : > { %818 = dma.hbm_to_vmem [thread:$0]  (!%p1180_p0), %s1241_s10, 256, %s1244_s1, %s1254_s23, %s1534_s29, %s1534_s29, %s1533_s19  }
  0x55   : > { %s256_s14 = scalar_lea.vmem [#allocation7], %s1173_s6  ;;  %s949_s26 = scalar_lea.hbm %s1250_s24, 256 }
  0x56   : > { %s266_s9 = sshll.u32 %s256_s14, 4  ;;  %p950_p11 = scmp.ne.s32.totalorder %s1250_s24, %s949_s26  ;;  %s1282_s9 = int_to_ptr.vmem [resolvable:$true] %s266_s9 }
  0x57   : > { %s954_s11 = scalar_lea.hbm %s1503_s2, 512  ;;  %p955_p5 = scmp.lt.u32.totalorder %s1250_s24, %s1503_s2 }
  0x58   : > { %p952_p2 = pnand %p950_p11, %p1202_p4  ;;  %p956_p7 = scmp.lt.u32.totalorder %s954_s11, %s949_s26 }
  0x59   : > { %p958_p8 = scmp.lt.u32.totalorder %s949_s26, %s1250_s24 }
  0x5a   : > { %p953_p3 = pneg %p952_p2  ;;  %p957_p10 = por %p956_p7, %p955_p5 }
  0x5c   : > { %p959_p9 = por %p958_p8, %p957_p10 }
  0x5e   : > { %p960_p12 = pnand %p959_p9, %p953_p3 }
  0x60   : > { %963 = shalt.err (!%p960_p12)
}
  0x61   : > { %s964_s1 = scalar_lea.vmem %s1282_s9, 256  ;;  %s1071_s23 = smov [#allocation7]  }
  0x62   : > { %p965_p1 = scmp.ne.s32.totalorder %s1282_s9, %s964_s1  ;;  %s969_s6 = sshll.u32 %s1071_s23, 4  ;;  %s970_s6 = int_to_ptr.vmem [resolvable:$false] %s969_s6 }
  0x63   : > { %s971_s10 = scalar_lea.vmem %s970_s6, 512  ;;  %p972_p11 = scmp.lt.s32.totalorder %s1282_s9, %s970_s6 }
  0x64   : > { %p967_p6 = pnand %p965_p1, %p1202_p4  ;;  %p973_p2 = scmp.lt.s32.totalorder %s971_s10, %s964_s1 }
  0x66   : > { %p968_p13 = pneg %p967_p6  ;;  %p974_p5 = por %p973_p2, %p972_p11 }
  0x68   : > { %p975_p7 = pnand %p974_p5, %p968_p13 }
  0x6a   : > { %978 = shalt.err (!%p975_p7)
}
  0x6b   : > { %824 = dma.hbm_to_vmem [thread:$0]  (!%p1180_p0), %s1250_s24, 256, %s1282_s9, %s1196_s22, %s1534_s29, %s1534_s29, %s1533_s19  }
  0x6c   : > { %p1535_p4 = scmp.ne.s32.totalorder %s1531_s13, 0 }
  0x6d   : > { %s1312_s25 = sand.u32 (!%p1535_p4), 1, %s1049_s16   ;;  %p1536_p3 = scmp.ne.s32.totalorder (!%p1535_p4), %s1522_s27, 0 }
  0x6e   : > { %285 = sbr.rel (%p1535_p4) target bundleno = 541 (0x21d), region = 36  ;;  %s1315_s14 = sshll.u32 (!%p1535_p4), %s1312_s25, 4 }
  0x6f   : > { %s288_s8 = scalar_lea.sflag (!%p1535_p4), [#allocation3], %s1312_s25  ;;  %s291_s26 = scalar_lea.vmem (!%p1535_p4), [#allocation2], %s1315_s14 }
  0x75   : > { %1032 = dma.done.wait (%p1536_p3), %s288_s8, 256  }
  0x76   : > { %1034 = vsyncadd (%p1536_p3), %s288_s8, 4294967040  ;;  %s296_s22 = sand.u32 1, %s1133_s21   ;;  %s300_s13 = scalar_lea.vmem [#allocation5], %s1315_s14 }
  0x77   : > { %s297_s24 = scalar_lea.sflag [#allocation6], %s296_s22 }
  0x78   : > { %1036 = dma.done.wait (%p1536_p3), %s297_s24, 512  }
  0x79   : > { %1038 = vsyncadd (%p1536_p3), %s297_s24, 4294966784  ;;  %p354_p0 = scmp.lt.s32.totalorder %s1057_s18, 1  ;;  %v404_v0 = vlaneseq  ;;  %v1335_v5 = vld [vmem:[%s300_s13] sm:$0xff]  ;;  %v1337_v6 = vld [vmem:[%s300_s13 + $0x8] sm:$0xff]  ;;  %s1072_s27 = smov 16   ;;  %vm453_vm4 = vcmask 1047680  }
  0x7a   : > { %v409_v8 = vrot.slane %v1335_v5, 7  ;;  %v410_v9 = vrot.slane %v1337_v6, 7  ;;  %v426_v11 = vrot.slane %v1335_v5, 1  ;;  %v427_v12 = vrot.slane %v1337_v6, 1  ;;  %s1073_s7 = smov 113   ;;  %s1074_s11 = smov 127  }
  0x7b   : > { %s355_s19 = scalar_select %p354_p0, %s1057_s18, 1  ;;  %v405_v1 = vshrl.u32 %v404_v0, 7  ;;  %v441_v13 = vmul.f32 2.0, %v1335_v5  ;;  %v442_v15 = vmul.f32 2.0, %v1337_v6  ;;  %vm362_vm5 = vcmask 130048   ;;  %v364_v46 = vld [vmem:[%s291_s26] sm:$0xff] }
  0x7c   : > { %s798_s12 = sshll.u32 %s1312_s25, 3  ;;  %v1075_v44 = vmov 0.0   ;;  %s309_s1 = scalar_lea.vmem [#allocation7], %s1315_s14  ;;  %v365_v48 = vld [vmem:[%s291_s26 + $0x8] sm:$0xff]  ;;  %v378_v50 = vsub.f32 1.0, %v364_v46  ;;  %vm597_vm8 = vcmask 1040384  }
  0x7d   : > { %s799_s29 = sshll.u32 %s355_s19, 1  ;;  %v420_v2 = vsub.s32 0, %v405_v1  ;;  %v406_v3 = vadd.s32 8, %v405_v1  ;;  %v437_v4 = vsub.s32 1, %v405_v1  ;;  %vm407_vm0 = vcmp.eq.s32.totalorder %v405_v1, 0  ;;  %s1368_s20 = scalar_lea.vmem [#allocation8], %s798_s12 }
  0x7e   : > { %s357_s21 = scalar_lea.vmem %s1504_s3, %s799_s29  ;;  %vm411_vm1 = vcmp.lt.s32.totalorder %v405_v1, 1  ;;  %vm428_vm2 = vcmp.lt.s32.totalorder %v405_v1, 7  ;;  %363 = vst.msk [vmem:[%s1368_s20] sm:$0xff] %vm362_vm5, %v1075_v44  ;;  %v1373_v45 = vld [vmem:[%s309_s1] sm:$0xff]  ;;  %v1377_v47 = vld [vmem:[%s309_s1 + $0x8] sm:$0xff]  ;;  %v379_v52 = vsub.f32 1.0, %v365_v48 }
  0x7f   : > { %v373_v7 = vld [vmem:[%s357_s21] sm:$0x3]  ;;  %vm425_vm3 = vcmp.eq.s32.totalorder %v406_v3, 15  ;;  %v413_v16 = vsel %vm411_vm1, %v410_v9, %v409_v8  ;;  %v429_v18 = vsel %vm428_vm2, %v426_v11, %v427_v12  ;;  %v412_v19 = vsel %vm411_vm1, %v409_v8, %v410_v9  ;;  %s801_s23 = sshll.u32 %s1057_s18, 7  ;;  %s629_s6 = sshll.u32 %s1368_s20, 4  ;;  %s1452_s6 = int_to_ptr.vmem [resolvable:$true] %s629_s6 }
  0x80   : > { %v421_v10 = vrot.slane %v373_v7, %v420_v2  ;;  %v438_v14 = vrot.slane %v373_v7, %v437_v4  ;;  %v430_v20 = vsel %vm428_vm2, %v427_v12, %v426_v11  ;;  %v444_v24 = vadd.f32 %v442_v15, %v412_v19  ;;  %s1450_s8 = scalar_lea.hbm %s1505_s4, %s801_s23  ;;  %s615_s26 = scalar_lea.sflag [#allocation4], %s1312_s25 }
  0x81   : > { %v376_v49 = vsub.f32 1.0, %v1373_v45  ;;  %v377_v51 = vsub.f32 1.0, %v1377_v47  ;;  %v374_v53 = vmul.f32 %v1373_v45, %v364_v46  ;;  %v375_v55 = vmul.f32 %v1377_v47, %v365_v48  ;;  %s979_s22 = scalar_lea.vmem %s1452_s6, 128  ;;  %p1537_p8 = scmp.ne.s32.totalorder %s1523_s28, 0 }
  0x82   : > { %v422_v17 = vsel %vm407_vm0, %v421_v10, %v413_v16  ;;  %v440_v23 = vsel %vm425_vm3, %v438_v14, %v430_v20  ;;  %v398_v11 = vsub.f32 %v364_v46, %v1373_v45  ;;  %v536_v14 = vmul.f32 %v1373_v45, %v1335_v5  ;;  %p980_p10 = scmp.ne.s32.totalorder %s1452_s6, %s979_s22  ;;  %s1076_s18 = smov [#allocation8]  }
  0x83   : > { %v1348_v21 = vsub.f32 %v429_v18, %v422_v17  ;;  %v443_v22 = vadd.f32 %v441_v13, %v422_v17  ;;  %v1352_v26 = vsub.f32 %v440_v23, %v412_v19  ;;  %v446_v27 = vadd.f32 %v444_v24, %v440_v23  ;;  %s983_s24 = sshll.u32 %s1076_s18, 4  ;;  %s984_s24 = int_to_ptr.vmem [resolvable:$false] %s983_s24 }
  0x84   : > { %v380_v54 = vmul.f32 %v378_v50, %v376_v49  ;;  %v381_v56 = vmul.f32 %v379_v52, %v377_v51  ;;  %v399_v13 = vsub.f32 %v365_v48, %v1377_v47  ;;  %v537_v16 = vmul.f32 %v1377_v47, %v1337_v6  ;;  %p981_p9 = pnand %p980_p10, %p1537_p8  ;;  %s985_s13 = scalar_lea.vmem %s984_s24, 256 }
  0x85   : > { %488 = vrot.lane.b32.xlu0 %v1348_v21, %s1072_s27  ;;  %v445_v25 = vadd.f32 %v443_v22, %v429_v18  ;;  %v539_v18 = vsel %vm362_vm5, %v536_v14, 0.0  ;;  %v548_v19 = vsel %vm362_vm5, %v1373_v45, 0.0  ;;  %v549_v24 = vsel %vm362_vm5, %v1377_v47, 0.0  ;;  %p986_p1 = scmp.lt.s32.totalorder %s1452_s6, %s984_s24  ;;  %p987_p6 = scmp.lt.s32.totalorder %s985_s13, %s979_s22 }
  0x86   : > { %v382_v57 = vadd.f32 %v380_v54, %v374_v53  ;;  %v383_v58 = vadd.f32 %v381_v56, %v375_v55  ;;  %v540_v23 = vsel %vm362_vm5, %v537_v16, 0.0  ;;  %vm599_vm9 = vcmask 1041408   ;;  %p982_p12 = pneg %p981_p9 }
  0x87   : > { %454 = vrot.lane.b32.xlu1 %v445_v25, %s1072_s27  ;;  %vm601_vm10 = vcmask 1042432   ;;  %vm603_vm11 = vcmask 1043456   ;;  %vm605_vm12 = vcmask 1044480   ;;  %vm607_vm13 = vcmask 1045504   ;;  %p988_p13 = por %p987_p6, %p986_p1 }
  0x88   : > { %v384_v59 = vadd.f32 1e-08, %v382_v57  ;;  %v385_v60 = vadd.f32 1e-08, %v383_v58  ;;  %v394_v7 = vsub.f32 1.0, %v382_v57  ;;  %v395_v9 = vsub.f32 1.0, %v383_v58 }
  0x89   : > { %491 = vrot.lane.b32.xlu0 %v1352_v26, %s1072_s27  ;;  %vm609_vm14 = vcmask 1046528   ;;  %p989_p11 = pnand %p988_p13, %p982_p12 }
  0x8a   : > { %885 = vlog2.f32 %v384_v59 }
  0x8b   : > { %457 = vrot.lane.b32.xlu1 %v446_v27, %s1072_s27  ;;  %887 = vlog2.f32 %v385_v60 }
  0x94   : > { %v886_v61 = vpop.eup %885 }
  0x95   : > { %v888_v62 = vpop.eup %887  ;;  %v1385_v63 = vmul.f32 0.6931472, %v886_v61 }
  0x96   : > { %v1387_v1 = vmul.f32 0.6931472, %v888_v62 }
  0x97   : > { %v390_v2 = vsub.f32 0.0, %v1385_v63 }
  0x98   : > { %v391_v3 = vsub.f32 0.0, %v1387_v1 }
  0x99   : > { %v392_v4 = vmul.f32 %v390_v2, %v382_v57 }
  0x9a   : > { %v393_v8 = vmul.f32 %v391_v3, %v383_v58 }
  0x9b   : > { %v1395_v10 = vmul.f32 %v394_v7, %v392_v4 }
  0x9c   : > { %v1398_v12 = vmul.f32 %v395_v9, %v393_v8 }
  0x9d   : > { %v400_v15 = vmul.f32 %v398_v11, %v1395_v10 }
  0x9e   : > { %v401_v17 = vmul.f32 %v399_v13, %v1398_v12 }
  0x9f   : > { %v534_v22 = vmul.f32 %v400_v15, %v1335_v5 }
  0xf7   : > { %v489_v28 = vpop.permute.xlu0 %488 }
  0xf8   : > { %v490_v29 = vsel %vm453_vm4, %v489_v28, %v1348_v21  ;;  %v557_v28 = vsel %vm362_vm5, %v400_v15, 0.0 }
  0xf9   : > { %494 = vrot.lane.b32.xlu0 %v490_v29, %s1072_s27  ;;  %v455_v30 = vpop.permute.xlu1 %454  ;;  %v541_v29 = vadd.f32 %v540_v23, %v539_v18 }
  0xfa   : > { %v456_v31 = vsel %vm453_vm4, %v455_v30, %v445_v25  ;;  %v550_v30 = vadd.f32 %v549_v24, %v548_v19 }
  0xfb   : > { %v492_v32 = vpop.permute.xlu0 %491 }
  0xfc   : > { %v493_v33 = vsel %vm453_vm4, %v492_v32, %v1352_v26 }
  0xfd   : > { %460 = vrot.lane.b32.xlu0 %v456_v31, %s1072_s27  ;;  %496 = vrot.lane.b32.xlu1 %v493_v33, %s1072_s27  ;;  %v458_v34 = vpop.permute.xlu1 %457  ;;  %v558_v31 = vsel %vm362_vm5, %v401_v17, 0.0 }
  0xfe   : > { %v459_v35 = vsel %vm453_vm4, %v458_v34, %v446_v27  ;;  %v575_v34 = vmul.f32 %v534_v22, %v1335_v5 }
 0x101   : > { %462 = vrot.lane.b32.xlu1 %v459_v35, %s1072_s27 }
 0x16b   : > { %v495_v36 = vpop.permute.xlu0 %494 }
 0x16c   : > { %v498_v37 = vsel %vm453_vm4, %v495_v36, %v1348_v21  ;;  %v566_v36 = vsel %vm362_vm5, %v534_v22, 0.0  ;;  %v402_v22 = vmul.f32 %v1395_v10, %v1373_v45 }
 0x16d   : > { %510 = vrot.lane.b32.xlu0 %v498_v37, %s1073_s7 }
 0x16f   : > { %v461_v38 = vpop.permute.xlu0 %460  ;;  %v497_v39 = vpop.permute.xlu1 %496 }
 0x170   : > { %v464_v40 = vsel %vm453_vm4, %v461_v38, %v445_v25  ;;  %v499_v41 = vsel %vm453_vm4, %v497_v39, %v1352_v26  ;;  %v535_v25 = vmul.f32 %v401_v17, %v1337_v6  ;;  %v542_v39 = vrot.slane %v541_v29, 4 }
 0x171   : > { %470 = vrot.lane.b32.xlu0 %v464_v40, %s1074_s11  ;;  %512 = vrot.lane.b32.xlu1 %v499_v41, %s1073_s7 }
 0x172   : > { %v576_v35 = vmul.f32 %v535_v25, %v1337_v6  ;;  %v567_v38 = vsel %vm362_vm5, %v535_v25, 0.0  ;;  %v543_v50 = vadd.f32 %v542_v39, %v541_v29 }
 0x173   : > { %v463_v42 = vpop.permute.xlu1 %462  ;;  %v568_v46 = vadd.f32 %v567_v38, %v566_v36 }
 0x174   : > { %v465_v43 = vsel %vm453_vm4, %v463_v42, %v446_v27  ;;  %v450_v27 = vand.u32 127, %v404_v0  ;;  %v551_v0 = vrot.slane %v550_v30, 4  ;;  %v578_v44 = vsel %vm362_vm5, %v576_v35, 0.0 }
 0x175   : > { %480 = vrot.lane.b32.xlu0 %v464_v40, %s1073_s7  ;;  %472 = vrot.lane.b32.xlu1 %v465_v43, %s1074_s11  ;;  %v520_v40 = vmul.f32 2.0, %v1348_v21  ;;  %v521_v21 = vmul.f32 2.0, %v1352_v26  ;;  %v569_v60 = vrot.slane %v568_v46, 4  ;;  %v544_v7 = vrot.slane %v543_v50, 2 }
 0x176   : > { %vm451_vm6 = vcmp.ne.s32.totalorder %v450_v27, 0  ;;  %vm452_vm7 = vcmp.ne.s32.totalorder %v450_v27, 15  ;;  %v552_v51 = vadd.f32 %v551_v0, %v550_v30  ;;  %v403_v27 = vmul.f32 %v1398_v12, %v1377_v47 }
 0x177   : > { %v570_v17 = vadd.f32 %v569_v60, %v568_v46  ;;  %v545_v24 = vadd.f32 %v544_v7, %v543_v50 }
 0x178   : > { %v553_v8 = vrot.slane %v552_v51, 2 }
 0x179   : > { %502 = vrot.lane.b32.xlu0 %v498_v37, %s1074_s11  ;;  %482 = vrot.lane.b32.xlu1 %v465_v43, %s1073_s7  ;;  %v559_v37 = vadd.f32 %v558_v31, %v557_v28  ;;  %v577_v43 = vsel %vm362_vm5, %v575_v34, 0.0  ;;  %v571_v31 = vrot.slane %v570_v17, 2  ;;  %v546_v34 = vrot.slane %v545_v24, 1 }
 0x17a   : > { %v579_v52 = vadd.f32 %v578_v44, %v577_v43  ;;  %v554_v23 = vadd.f32 %v553_v8, %v552_v51 }
 0x17b   : > { %v560_v48 = vrot.slane %v559_v37, 4 }
 0x17c   : > { %v580_v9 = vrot.slane %v579_v52, 4  ;;  %v555_v35 = vrot.slane %v554_v23, 1 }
 0x17d   : > { %504 = vrot.lane.b32.xlu1 %v499_v41, %s1074_s11  ;;  %v561_v62 = vadd.f32 %v560_v48, %v559_v37  ;;  %v572_v37 = vadd.f32 %v571_v31, %v570_v17 }
 0x17e   : > { %v581_v30 = vadd.f32 %v580_v9, %v579_v52  ;;  %v556_v39 = vadd.f32 %v555_v35, %v554_v23 }
 0x17f   : > { %v573_v47 = vrot.slane %v572_v37, 1 }
 0x180   : > { %v582_v10 = vrot.slane %v581_v30, 2 }
 0x1df   : > { %v511_v20 = vpop.permute.xlu0 %510 }
 0x1e0   : > { %v516_v5 = vsel %vm451_vm6, %v511_v20, 0.0  ;;  %v562_v20 = vrot.slane %v561_v62, 2 }
 0x1e1   : > { %v522_v53 = vadd.f32 %v520_v40, %v516_v5  ;;  %v583_v40 = vadd.f32 %v582_v10, %v581_v30 }
 0x1e3   : > { %v471_v32 = vpop.permute.xlu0 %470  ;;  %v513_v33 = vpop.permute.xlu1 %512  ;;  %v584_v1 = vrot.slane %v583_v40, 1 }
 0x1e4   : > { %v476_v49 = vsel %vm452_vm7, %v471_v32, 0.0  ;;  %v517_v57 = vsel %vm451_vm6, %v513_v33, 0.0  ;;  %v563_v33 = vadd.f32 %v562_v20, %v561_v62 }
 0x1e5   : > { %v523_v11 = vadd.f32 %v521_v21, %v517_v57  ;;  %v585_v48 = vadd.f32 %v584_v1, %v583_v40 }
 0x1e6   : > { %v564_v38 = vrot.slane %v563_v33, 1 }
 0x1e7   : > { %v481_v41 = vpop.permute.xlu0 %480  ;;  %v473_v42 = vpop.permute.xlu1 %472 }
 0x1e8   : > { %v486_v6 = vsel %vm451_vm6, %v481_v41, 0.0  ;;  %v477_v4 = vsel %vm452_vm7, %v473_v42, 0.0  ;;  %v565_v42 = vadd.f32 %v564_v38, %v563_v33 }
 0x1e9   : > { %v518_v54 = vsub.f32 %v476_v49, %v486_v6 }
 0x1eb   : > { %v503_v55 = vpop.permute.xlu0 %502  ;;  %v483_v56 = vpop.permute.xlu1 %482  ;;  %v526_v13 = vand.u32 2147483647, %v518_v54  ;;  %v611_v54 = vld [vmem:[%s1368_s20] sm:$0xff] }
 0x1ec   : > { %v508_v58 = vsel %vm452_vm7, %v503_v55, 0.0  ;;  %v487_v59 = vsel %vm451_vm6, %v483_v56, 0.0 }
 0x1ed   : > { %v524_v61 = vadd.f32 %v522_v53, %v508_v58  ;;  %v519_v14 = vsub.f32 %v477_v4, %v487_v59 }
 0x1ef   : > { %v528_v26 = vand.u32 2147483647, %v524_v61  ;;  %v505_v15 = vpop.permute.xlu1 %504  ;;  %v527_v28 = vand.u32 2147483647, %v519_v14 }
 0x1f0   : > { %v509_v16 = vsel %vm452_vm7, %v505_v15, 0.0 }
 0x1f1   : > { %v530_v18 = vadd.f32 %v528_v26, %v526_v13  ;;  %v525_v19 = vadd.f32 %v523_v11, %v509_v16 }
 0x1f3   : > { %v532_v25 = vmul.f32 %v530_v18, %v390_v2  ;;  %v529_v29 = vand.u32 2147483647, %v525_v19  ;;  %v547_v2 = vadd.f32 %v546_v34, %v545_v24 }
 0x1f5   : > { %v531_v32 = vadd.f32 %v529_v29, %v527_v28  ;;  %v586_v36 = vadd.f32 %v532_v25, %v402_v22  ;;  %v598_v44 = vsel %vm597_vm8, %v547_v2, %v556_v39 }
 0x1f6   : > { %v600_v6 = vsel %vm599_vm9, %v598_v44, %v565_v42 }
 0x1f7   : > { %v533_v45 = vmul.f32 %v531_v32, %v391_v3  ;;  %v588_v0 = vsel %vm362_vm5, %v586_v36, 0.0  ;;  %v574_v3 = vadd.f32 %v573_v47, %v572_v37 }
 0x1f9   : > { %v587_v63 = vadd.f32 %v533_v45, %v403_v27  ;;  %v602_v50 = vsel %vm601_vm10, %v600_v6, %v574_v3 }
 0x1fa   : > { %v604_v52 = vsel %vm603_vm11, %v602_v50, %v585_v48 }
 0x1fb   : > { %v589_v41 = vsel %vm362_vm5, %v587_v63, 0.0 }
 0x1fc   : > { %v590_v12 = vadd.f32 %v589_v41, %v588_v0 }
 0x1fe   : > { %v591_v43 = vrot.slane %v590_v12, 4 }
 0x200   : > { %v592_v5 = vadd.f32 %v591_v43, %v590_v12 }
 0x202   : > { %v593_v46 = vrot.slane %v592_v5, 2 }
 0x204   : > { %v594_v49 = vadd.f32 %v593_v46, %v592_v5 }
 0x206   : > { %v595_v51 = vrot.slane %v594_v49, 1 }
 0x208   : > { %v596_v53 = vadd.f32 %v595_v51, %v594_v49 }
 0x20a   : > { %v606_v21 = vsel %vm605_vm12, %v604_v52, %v596_v53 }
 0x20b   : > { %v608_v55 = vsel %vm607_vm13, %v606_v21, 0.0 }
 0x20c   : > { %v610_v56 = vsel %vm609_vm14, %v608_v55, 0.0 }
 0x20d   : > { %v612_v57 = vadd.f32 %v611_v54, %v610_v56 }
 0x20f   : > { %613 = vst.msk [vmem:[%s1368_s20] sm:$0xff] %vm362_vm5, %v612_v57 }
 0x210   : > { %992 = shalt.err (!%p989_p11)
}
 0x211   : > { %s993_s25 = scalar_lea.hbm %s1450_s8, 128  ;;  %s997_s9 = scalar_lea.hbm %s1505_s4, 256 }
 0x212   : > { %p994_p2 = scmp.ne.s32.totalorder %s1450_s8, %s993_s25  ;;  %p998_p4 = scmp.lt.u32.totalorder %s1450_s8, %s1505_s4 }
 0x213   : > { %p999_p3 = scmp.lt.u32.totalorder %s997_s9, %s993_s25  ;;  %p1001_p10 = scmp.lt.u32.totalorder %s993_s25, %s1450_s8 }
 0x214   : > { %p995_p5 = pnand %p994_p2, %p1537_p8 }
 0x215   : > { %p1000_p0 = por %p999_p3, %p998_p4 }
 0x216   : > { %p996_p7 = pneg %p995_p5 }
 0x217   : > { %p1002_p9 = por %p1001_p10, %p1000_p0 }
 0x219   : > { %p1003_p12 = pnand %p1002_p9, %p996_p7 }
 0x21b   : > { %1006 = shalt.err (!%p1003_p12)
}
 0x21c   : > { %813 = dma.vmem_to_hbm [thread:$0]  (%p1537_p8), %s1452_s6, 128, %s1450_s8, %s615_s26  }
 0x21d PF: > { %s1538_s27 = sld [smem:[#allocation13_spill]]  ;;  %s641_s7 = sand.u32 1, %s1045_s15  }
 0x21e   : > { %p1539_p1 = scmp.ne.s32.totalorder %s1525_s30, 0  ;;  %s642_s11 = scalar_lea.sflag [#allocation4], %s641_s7 }
 0x223   : > { %p1540_p6 = scmp.ge.s32.totalorder %s1538_s27, 2 }
 0x225   : > { %p826_p13 = pnand %p1540_p6, %p1539_p1 }
 0x227   : > { %1040 = dma.done.wait (!%p826_p13), %s642_s11, 128  }
 0x228   : > { %1042 = vsyncadd (!%p826_p13), %s642_s11, 4294967168  ;;  %s23_s20 = sadd.s32 1, %s1538_s27   ;;  %s1541_s28 = sld [smem:[#allocation15_spill]] }
 0x229   : > { %p20_p11 = scmp.ge.s32.totalorder %s23_s20, 4   ;;  %s1542_s18 = sld [smem:[#allocation12_spill]] }
 0x22a   : > { %s1543_s19 = sld [smem:[#allocation14_spill]]  ;;  %s1544_s15 = smov %s1049_s16 }
 0x22b   : > { %s1545_s16 = smov %s1053_s17  ;;  %22 = sbr.rel (!%p20_p11) target bundleno = 10 (0xa), region = 113 }
 0x22e   : > { %s1546_s17 = smov %s1541_s28 }
 0x232   :  { %647 = vsyncpa [#allocation3], 1 }
 0x233   :  { %649 = vsyncpa [#allocation3 + $0x1], 1 }
 0x234   :  { %650 = vsyncpa [#allocation6], 1 }
 0x235   :  { %652 = vsyncpa [#allocation6 + $0x1], 1 }
 0x236   :  { %653 = vsyncpa [#allocation4], 1 }
 0x237   :  { %655 = vsyncpa [#allocation4 + $0x1], 1 }

</bundles_post_ra>
